<compile_context>
chip_gen: v7x
topology: tpu7x:2x2x1
jax: 0.10.0
libtpu: 0.0.40
codegen_flags: <defaults>
</compile_context>

<pallas_src>
import jax
import jax.numpy as jnp
from jax.experimental import pallas as pl
from jax.experimental.pallas import tpu as pltpu

_SQRT_2_OVER_PI = 0.7978845608028654  # sqrt(2/pi), precomputed Python float


def _gelu_kernel(x_ref, o_ref):
    # Upcast to f32: keeps the polynomial + tanh on the f32 VPU/EUP path
    # (needed on v5e which has no bf16 VPU/EUP, and improves bf16 accuracy
    # everywhere).  Kernel stays HBM-bound, so the extra f32 math is free.
    x = x_ref[...].astype(jnp.float32)
    x2 = x * x
    inner = _SQRT_2_OVER_PI * x * (1.0 + 0.044715 * x2)
    y = 0.5 * x * (1.0 + jnp.tanh(inner))
    o_ref[...] = y.astype(o_ref.dtype)


def _cdiv(a, b):
    return -(-a // b)


def _round_up(n, m):
    return ((n + m - 1) // m) * m


def gelu_pallas(x):
    """Tanh-approximation GELU. Works for any shape / float dtype."""
    orig_shape = x.shape
    dtype = x.dtype
    total = x.size
    if total == 0:
        return x

    itemsize = jnp.dtype(dtype).itemsize
    LANE = 128
    # Sublane packing: 8 rows for f32, 16 for bf16, 32 for 8-bit types.
    sub = max(8, 32 // max(itemsize, 1))

    # Lane-dense 2-D re-view of the flattened tensor.
    TC_TARGET = 2048
    TC = TC_TARGET if total >= TC_TARGET else _round_up(total, LANE)
    rows = _cdiv(total, TC)

    # Row tile: aim for ~8 MiB per block (in + out, each double-buffered,
    # -> ~32 MiB live VMEM; safe on v5e/v6e's 128 MiB and v7x's 64 MiB).
    TARGET_BLOCK_BYTES = 8 * 1024 * 1024
    tr = max(sub, (TARGET_BLOCK_BYTES // (TC * itemsize)) // sub * sub)
    tr = min(tr, _round_up(rows, sub))
    # Keep >=2 grid steps when there is enough work so the "parallel" axis
    # can shard across v7x's two TensorCores.
    if rows >= 2 * sub:
        half = max(sub, (_cdiv(rows, 2) // sub) * sub)
        tr = min(tr, half)

    padded_rows = _round_up(rows, tr)
    padded_total = padded_rows * TC

    flat = x.reshape(-1)
    if padded_total != total:
        flat = jnp.pad(flat, (0, padded_total - total))
    x2d = flat.reshape(padded_rows, TC)

    grid = (padded_rows // tr,)

    out = pl.pallas_call(
        _gelu_kernel,
        out_shape=jax.ShapeDtypeStruct((padded_rows, TC), dtype),
        grid_spec=pltpu.PrefetchScalarGridSpec(
            num_scalar_prefetch=0,
            grid=grid,
            in_specs=[pl.BlockSpec((tr, TC), lambda i: (i, 0))],
            out_specs=pl.BlockSpec((tr, TC), lambda i: (i, 0)),
        ),
        compiler_params=pltpu.CompilerParams(
            dimension_semantics=("parallel",),
            vmem_limit_bytes=48 * 1024 * 1024,
        ),
    )(x2d)

    out_flat = out.reshape(-1)
    if padded_total != total:
        out_flat = out_flat[:total]
    return out_flat.reshape(orig_shape)


def gelu_ref(x):
    xf = x.astype(jnp.float32)
    y = 0.5 * xf * (1.0 + jnp.tanh(jnp.sqrt(2.0 / jnp.pi)
                                   * (xf + 0.044715 * xf ** 3)))
    return y.astype(x.dtype)


if __name__ == "__main__":
    key = jax.random.PRNGKey(0)
    # Small shapes consistent with the GPT module: batch=2, seq=8, hidden=32.
    x = jax.random.normal(key, (2, 8, 32), dtype=jnp.float32)

    y = gelu_pallas(x)
    jax.block_until_ready(y)

    y_ref = gelu_ref(x)
    assert y.shape == x.shape and y.dtype == x.dtype
    assert jnp.allclose(y, y_ref, atol=1e-6, rtol=1e-6)

    print("KERNEL_OK")
</pallas_src>

<mosaic_0001>
module attributes {stable_mosaic.version = 11 : i64} {
  func.func @_gelu_kernel(%arg0: i32, %arg1: memref<8x512xf32, #tpu.memory_space<vmem>>, %arg2: memref<8x512xf32, #tpu.memory_space<vmem>>) attributes {dimension_semantics = [#tpu.dimension_semantics<parallel>], iteration_bounds = array<i64: 1>, scalar_prefetch = 0 : i64, scratch_operands = 0 : i64, tpu.core_type = #tpu.core_type<tc>, window_params = [{transform_indices = @transform_0, window_bounds = array<i64: 8, 512>}, {transform_indices = @transform_1, window_bounds = array<i64: 8, 512>}]} {
    %c0 = arith.constant 0 : index
    %c0_0 = arith.constant 0 : index
    %0 = vector.load %arg1[%c0, %c0_0] : memref<8x512xf32, #tpu.memory_space<vmem>>, vector<8x512xf32>
    %1 = arith.mulf %0, %0 : vector<8x512xf32>
    %cst = arith.constant 0.797884583 : f32
    %2 = vector.broadcast %cst : f32 to vector<8x512xf32>
    %3 = arith.mulf %2, %0 : vector<8x512xf32>
    %cst_1 = arith.constant 4.471500e-02 : f32
    %4 = vector.broadcast %cst_1 : f32 to vector<8x512xf32>
    %5 = arith.mulf %4, %1 : vector<8x512xf32>
    %cst_2 = arith.constant 1.000000e+00 : f32
    %6 = vector.broadcast %cst_2 : f32 to vector<8x512xf32>
    %7 = arith.addf %6, %5 : vector<8x512xf32>
    %8 = arith.mulf %3, %7 : vector<8x512xf32>
    %cst_3 = arith.constant 5.000000e-01 : f32
    %9 = vector.broadcast %cst_3 : f32 to vector<8x512xf32>
    %10 = arith.mulf %9, %0 : vector<8x512xf32>
    %11 = math.tanh %8 : vector<8x512xf32>
    %cst_4 = arith.constant 1.000000e+00 : f32
    %12 = vector.broadcast %cst_4 : f32 to vector<8x512xf32>
    %13 = arith.addf %12, %11 : vector<8x512xf32>
    %14 = arith.mulf %10, %13 : vector<8x512xf32>
    %c0_5 = arith.constant 0 : index
    %c0_6 = arith.constant 0 : index
    %15 = vector.load %arg2[%c0_5, %c0_6] : memref<8x512xf32, #tpu.memory_space<vmem>>, vector<8x512xf32>
    tpu.vector_store %arg2[%c0_5, %c0_6], %14 {strides = array<i32>} : memref<8x512xf32, #tpu.memory_space<vmem>>, vector<8x512xf32>,
    return
  }
  func.func @transform_0(%arg0: i32) -> (i32, i32) {
    %c0_i32 = arith.constant 0 : i32
    %c0_i32_0 = arith.constant 0 : i32
    return %arg0, %c0_i32 : i32, i32
  }
  func.func @transform_1(%arg0: i32) -> (i32, i32) {
    %c0_i32 = arith.constant 0 : i32
    %c0_i32_0 = arith.constant 0 : i32
    return %arg0, %c0_i32 : i32, i32
  }
}

</mosaic_0001>

<bundles_post_ra>
// kernel: tpu_custom_call.1
= control target key start
LH: loop header
LB: loop body
LE: loop exit
PB: predicated region body
PF: predicated region fallthrough
CT: control target
= control target key end

     0   :  { %6 = vsyncpa [#allocation3], 0  ;;  %s174_s0 = inlined_call_operand.hbm [shape: f32[8,512], index: 0, kind: input, shape index: {}]   ;;  %s175_s1 = inlined_call_operand.hbm [shape: f32[8,512], index: 1, kind: output, shape index: {}]  }
   0x1   :  { %7 = vsyncpa [#allocation4], 0  ;;  %s138_s6 = smov [#allocation2]   ;;  %s90_s10 = scalar_lea.hbm %s174_s0, 512 }
   0x2   :  { %s14_s7 = sshll.u32 %s138_s6, 4  ;;  %p91_p0 = scmp.ne.s32.totalorder %s174_s0, %s90_s10  ;;  %s15_s7 = int_to_ptr.vmem [resolvable:$true] %s14_s7 }
   0x3   :  { %p94_p1 = scmp.lt.u32.totalorder %s90_s10, %s174_s0 }
   0x5   :  { %p96_p2 = pnand %p94_p1, %p91_p0 }
   0x7   :  { %99 = shalt.err (!%p96_p2)
}
   0x8   :  { %s100_s15 = scalar_lea.vmem %s15_s7, 512  ;;  %p105_p4 = scmp.lt.s32.totalorder %s15_s7, %s15_s7 }
   0x9   :  { %p101_p3 = scmp.ne.s32.totalorder %s15_s7, %s100_s15  ;;  %p106_p5 = scmp.lt.s32.totalorder %s100_s15, %s100_s15 }
   0xb   :  { %p107_p6 = por %p106_p5, %p105_p4 }
   0xd   :  { %p108_p7 = pnand %p107_p6, %p101_p3 }
   0xf   :  { %111 = shalt.err (!%p108_p7)
}
  0x10   :  { %17 = dma.hbm_to_vmem [thread:$0]  %s174_s0, 512, %s15_s7, [#allocation3]  }
  0x11   :  { %134 = dma.done.wait [#allocation3], 512  }
  0x12   :  { %135 = vsyncadd [#allocation3], 4294966784  ;;  %v21_v0 = vld [vmem:[#allocation2] sm:$0xff]  ;;  %v22_v1 = vld [vmem:[#allocation2 + $0x8] sm:$0xff]  ;;  %s139_s0 = smov [#allocation5]  }
  0x13   :  { %v23_v2 = vld [vmem:[#allocation2 + $0x10] sm:$0xff]  ;;  %v25_v3 = vmul.f32 %v21_v0, %v21_v0  ;;  %v26_v4 = vmul.f32 %v22_v1, %v22_v1  ;;  %v24_v5 = vld [vmem:[#allocation2 + $0x18] sm:$0xff]  ;;  %v29_v6 = vmul.f32 0.7978846, %v21_v0  ;;  %v30_v9 = vmul.f32 0.7978846, %v22_v1 }
  0x14   :  { %v27_v7 = vmul.f32 %v23_v2, %v23_v2  ;;  %v28_v11 = vmul.f32 %v24_v5, %v24_v5  ;;  %v31_v12 = vmul.f32 0.7978846, %v23_v2  ;;  %v32_v16 = vmul.f32 0.7978846, %v24_v5  ;;  %s71_s18 = sshll.u32 %s139_s0, 4  ;;  %s72_s18 = int_to_ptr.vmem [resolvable:$true] %s71_s18 }
  0x15   :  { %v33_v8 = vmul.f32 0.044715, %v25_v3  ;;  %v34_v10 = vmul.f32 0.044715, %v26_v4  ;;  %v45_v24 = vmul.f32 0.5, %v21_v0  ;;  %v46_v26 = vmul.f32 0.5, %v22_v1  ;;  %p117_p9 = scmp.lt.s32.totalorder %s72_s18, %s72_s18 }
  0x16   :  { %v35_v13 = vmul.f32 0.044715, %v27_v7  ;;  %v36_v17 = vmul.f32 0.044715, %v28_v11  ;;  %v47_v29 = vmul.f32 0.5, %v23_v2  ;;  %v48_v32 = vmul.f32 0.5, %v24_v5 }
  0x17   :  { %v37_v14 = vadd.f32 1.0, %v33_v8  ;;  %v38_v15 = vadd.f32 1.0, %v34_v10  ;;  %s112_s19 = scalar_lea.vmem %s72_s18, 512 }
  0x18   :  { %v39_v18 = vadd.f32 1.0, %v35_v13  ;;  %v40_v21 = vadd.f32 1.0, %v36_v17  ;;  %p113_p8 = scmp.ne.s32.totalorder %s72_s18, %s112_s19  ;;  %p118_p10 = scmp.lt.s32.totalorder %s112_s19, %s112_s19 }
  0x19   :  { %v41_v19 = vmul.f32 %v37_v14, %v29_v6  ;;  %v42_v20 = vmul.f32 %v38_v15, %v30_v9 }
  0x1a   :  { %v43_v22 = vmul.f32 %v39_v18, %v31_v12  ;;  %v44_v23 = vmul.f32 %v40_v21, %v32_v16  ;;  %p119_p11 = por %p118_p10, %p117_p9 }
  0x1b   :  { %82 = vtanh.f32 %v41_v19 }
  0x1c   :  { %84 = vtanh.f32 %v42_v20  ;;  %p120_p12 = pnand %p119_p11, %p113_p8 }
  0x1d   :  { %86 = vtanh.f32 %v43_v22 }
  0x1e   :  { %88 = vtanh.f32 %v44_v23 }
  0x25   :  { %v83_v25 = vpop.eup %82 }
  0x26   :  { %v85_v27 = vpop.eup %84  ;;  %v53_v28 = vadd.f32 1.0, %v83_v25 }
  0x27   :  { %v87_v30 = vpop.eup %86  ;;  %v54_v31 = vadd.f32 1.0, %v85_v27 }
  0x28   :  { %v89_v33 = vpop.eup %88  ;;  %v57_v34 = vmul.f32 %v53_v28, %v45_v24  ;;  %v55_v35 = vadd.f32 1.0, %v87_v30 }
  0x29   :  { %v58_v36 = vmul.f32 %v54_v31, %v46_v26  ;;  %v56_v37 = vadd.f32 1.0, %v89_v33 }
  0x2a   :  { %61 = vst [vmem:[#allocation5] sm:$0xff] %v57_v34  ;;  %v59_v38 = vmul.f32 %v55_v35, %v47_v29 }
  0x2b   :  { %62 = vst [vmem:[#allocation5 + $0x8] sm:$0xff] %v58_v36  ;;  %v60_v39 = vmul.f32 %v56_v37, %v48_v32 }
  0x2c   :  { %63 = vst [vmem:[#allocation5 + $0x10] sm:$0xff] %v59_v38 }
  0x2d   :  { %64 = vst [vmem:[#allocation5 + $0x18] sm:$0xff] %v60_v39 }
  0x2e   :  { %123 = shalt.err (!%p120_p12)
}
  0x2f   :  { %s124_s22 = scalar_lea.hbm %s175_s1, 512 }
  0x30   :  { %p125_p13 = scmp.ne.s32.totalorder %s175_s1, %s124_s22  ;;  %p128_p0 = scmp.lt.u32.totalorder %s124_s22, %s175_s1 }
  0x32   :  { %p130_p1 = pnand %p128_p0, %p125_p13 }
  0x34   :  { %133 = shalt.err (!%p130_p1)
}
  0x35   :  { %74 = dma.vmem_to_hbm [thread:$0]  %s72_s18, 512, %s175_s1, [#allocation4]  }
  0x36   :  { %136 = dma.done.wait [#allocation4], 512  }
  0x37   :  { %137 = vsyncadd [#allocation4], 4294966784 }
  0x38   :  { %78 = vsyncpa [#allocation3], 1 }
  0x39   :  { %79 = vsyncpa [#allocation4], 1 }

</bundles_post_ra>
